<compile_context>
chip_gen: v5e
topology: v5e:2x2
jax: 0.10.0
libtpu: 0.0.40
codegen_flags: <defaults>
</compile_context>

<pallas_src>
import functools

import jax
import jax.numpy as jnp
from jax import lax
from jax.experimental import pallas as pl
from jax.experimental.pallas import tpu as pltpu


def _round_up(v, m):
    return -(-v // m) * m


def _vmem_limit_bytes():
    # Generation-aware scoped-VMEM limit: <= half of physical VMEM.
    # (v7x: 64 MiB per TensorCore -> 32 MiB; v5e/v6e: 128 MiB -> 48 MiB.)
    try:
        cap = getattr(pltpu.get_tpu_info(), "vmem_capacity_bytes", None)
        if cap:
            return int(min(48 * 1024 * 1024, cap // 2))
    except Exception:
        pass
    return 32 * 1024 * 1024


def _sige_conv2d_kernel(x_hbm, w_ref, b_ref, o_ref, xbuf, sem, *, kh_size, row_tile):
    """One (batch, output-row-tile) grid step.

    x_hbm: (N, Hp, Wo_p, K_p)  HBM ref of padded, (kw,cin)-folded activations.
    w_ref: (KH, K_p, Cout_p)   VMEM, folded weights (grid-invariant block).
    b_ref: (1, Cout_p)         VMEM, f32 bias.
    o_ref: (1, row_tile*Wo_p, Cout_p)  lane-dense output block.
    xbuf:  (2, row_tile+KH-1, Wo_p, K_p)  VMEM double buffer (scratch).
    sem:   (2,) DMA semaphores (scratch).
    """
    n = pl.program_id(0)
    r = pl.program_id(1)
    num_r = pl.num_programs(1)

    rows = row_tile + kh_size - 1                    # static halo window height
    wo_p, k_p = xbuf.shape[2], xbuf.shape[3]

    def start_fetch(batch_idx, tile_idx, slot_idx):
        pltpu.make_async_copy(
            x_hbm.at[batch_idx, pl.ds(tile_idx * row_tile, rows)],
            xbuf.at[slot_idx],
            sem.at[slot_idx],
        ).start()

    slot = r & 1

    # First row tile of a batch element fetches its own window (DMA exposed once
    # per batch element); later tiles were prefetched by the previous step.
    @pl.when(r == 0)
    def _():
        start_fetch(n, r, slot)

    # Lookahead prefetch of the next row tile of the SAME batch element, so the
    # prefetch never crosses the (megacore-parallel) batch axis and every started
    # DMA is waited on by the same core.
    @pl.when(r + 1 < num_r)
    def _():
        start_fetch(n, r + 1, 1 - slot)

    # Wait for this tile's window (src slice is a shape-matched dummy; only the
    # semaphore / destination matter for the wait).
    pltpu.make_async_copy(
        x_hbm.at[n, pl.ds(0, rows)], xbuf.at[slot], sem.at[slot]
    ).wait()

    # KH small & static -> unrolled; each dot is (row_tile*Wo_p, K_p) @ (K_p, Cout_p)
    # with f32 accumulation.  Leading-dim slices + tile-aligned reshapes only.
    acc = None
    for kh in range(kh_size):
        lhs = xbuf[slot, pl.ds(kh, row_tile)]        # (row_tile, Wo_p, K_p)
        lhs = lhs.reshape(row_tile * wo_p, k_p)      # layout-trivial (Wo_p % 8 == 0)
        part = jnp.dot(lhs, w_ref[kh], preferred_element_type=jnp.float32)
        acc = part if acc is None else acc + part

    acc = acc + b_ref[...]                           # (1, Cout_p) broadcast
    o_ref[0] = acc.astype(o_ref.dtype)


def sige_conv2d_nhwc(x, weight_hwio, bias, *, stride=(1, 1), padding=(1, 1),
                     dilation=(1, 1), groups=1, mode="full",
                     compute_dtype=None, row_tile=None):
    """Forward pass of SIGEConv2d, NHWC layout.

    x:           (N, H, W, Cin)
    weight_hwio: (KH, KW, Cin, Cout)
    bias:        (Cout,) or None
    mode:        'full' uses `padding`; 'sparse'/'profile' force padding (0, 0).
    """
    # TODO(synk): groups > 1, stride > 1 and dilation > 1 are not wired into the
    # Pallas hot path (the SIGE module configs exercised here do not use them).
    assert groups == 1 and tuple(stride) == (1, 1) and tuple(dilation) == (1, 1)
    assert x.ndim == 4, "SIGEConv2d only supports 4-D inputs"

    if isinstance(padding, int):
        padding = (padding, padding)
    if mode == "full":
        pad_h, pad_w = int(padding[0]), int(padding[1])
    elif mode in ("sparse", "profile"):
        pad_h, pad_w = 0, 0
    else:
        raise NotImplementedError("Unknown mode: %s" % mode)

    out_dtype = x.dtype
    if compute_dtype is not None:
        x = x.astype(compute_dtype)
        weight_hwio = weight_hwio.astype(compute_dtype)
    cdtype = x.dtype
    itemsize = jnp.dtype(cdtype).itemsize

    N, H, W, Cin = x.shape
    KH, KW, _, Cout = weight_hwio.shape
    Ho = H + 2 * pad_h - KH + 1
    Wo = W + 2 * pad_w - KW + 1
    assert Ho > 0 and Wo > 0

    w_align = 16 if cdtype == jnp.bfloat16 else 8
    wo_p = _round_up(Wo, w_align)                    # sublane-aligned output width
    k_p = _round_up(KW * Cin, 128)                   # lane-dense contraction dim
    cout_p = _round_up(Cout, 128)                    # lane-dense output stores

    if row_tile is None:
        # Fill the 256-wide MXU (M = row_tile * wo_p >= 256) while keeping the
        # double-buffered halo window comfortably small (<= ~8 MiB).
        th = _round_up(max(8, -(-256 // wo_p)), 8)
        th = min(th, _round_up(Ho, 8))
        while th > 8 and 2 * (th + KH - 1) * wo_p * k_p * itemsize > 8 * 1024 * 1024:
            th -= 8
    else:
        th = int(row_tile)
    ho_p = _round_up(Ho, th)
    hp_p = ho_p + KH - 1
    wp_p = wo_p + KW - 1

    # Conv zero padding + alignment padding fused into one XLA pad.
    x_p = jnp.pad(x, ((0, 0),
                      (pad_h, hp_p - H - pad_h),
                      (pad_w, wp_p - W - pad_w),
                      (0, 0)))

    # Fold the KW taps into the channel (lane) dim in the wrapper (pure layout
    # plumbing) so the kernel does no concat / sublane-shift work at all.
    x_kw = jnp.concatenate([x_p[:, :, kw:kw + wo_p, :] for kw in range(KW)], axis=-1)
    x_kw = jnp.pad(x_kw, ((0, 0), (0, 0), (0, 0), (0, k_p - KW * Cin)))
    # -> (N, hp_p, wo_p, k_p)

    # Folded weights: (KH, KW*Cin, Cout) -> (KH, K_p, Cout_p); K ordered (kw, cin)
    # to match the activation fold above.
    w_f = weight_hwio.reshape(KH, KW * Cin, Cout)
    w_f = jnp.pad(w_f, ((0, 0), (0, k_p - KW * Cin), (0, cout_p - Cout)))

    if bias is None:
        bias = jnp.zeros((Cout,), jnp.float32)
    b_p = jnp.pad(bias.astype(jnp.float32), (0, cout_p - Cout)).reshape(1, cout_p)

    grid = (N, ho_p // th)
    rows = th + KH - 1
    kernel = functools.partial(_sige_conv2d_kernel, kh_size=KH, row_tile=th)

    out_flat = pl.pallas_call(
        kernel,
        out_shape=jax.ShapeDtypeStruct((N, ho_p * wo_p, cout_p), out_dtype),
        grid=grid,
        in_specs=[
            # Activations stay in HBM; the kernel DMAs only the halo row window.
            pl.BlockSpec(memory_space=pl.ANY),
            # Grid-invariant blocks (block index never changes -> DMA'd once).
            pl.BlockSpec((KH, k_p, cout_p), lambda n, r: (0, 0, 0)),
            pl.BlockSpec((1, cout_p), lambda n, r: (0, 0)),
        ],
        out_specs=pl.BlockSpec((1, th * wo_p, cout_p), lambda n, r: (n, r, 0)),
        scratch_shapes=[
            pltpu.VMEM((2, rows, wo_p, k_p), cdtype),   # double-buffered halo window
            pltpu.SemaphoreType.DMA((2,)),
        ],
        compiler_params=pltpu.CompilerParams(
            # Batch axis may split across megacore TCs; the row axis must stay
            # sequential per core because of the manual lookahead prefetch.
            dimension_semantics=("parallel", "arbitrary"),
            vmem_limit_bytes=_vmem_limit_bytes(),
        ),
    )(x_kw, w_f, b_p)

    out = out_flat.reshape(N, ho_p, wo_p, cout_p)
    return out[:, :Ho, :Wo, :Cout]


def sige_conv2d(x_nchw, weight_hwio, bias, **kwargs):
    """PyTorch-layout (NCHW) adapter. Prefer sige_conv2d_nhwc on the hot path."""
    x = jnp.transpose(x_nchw, (0, 2, 3, 1))
    y = sige_conv2d_nhwc(x, weight_hwio, bias, **kwargs)
    return jnp.transpose(y, (0, 3, 1, 2))


def _reference_conv_nhwc(x, weight_hwio, bias, pad):
    y = lax.conv_general_dilated(
        x, weight_hwio, window_strides=(1, 1),
        padding=((pad[0], pad[0]), (pad[1], pad[1])),
        dimension_numbers=("NHWC", "HWIO", "NHWC"))
    return y + bias[None, None, None, :]


if __name__ == "__main__":
    # Conv2d(in_channels=4, out_channels=8, kernel_size=3, padding=1, bias=True)
    N, H, W, Cin = 2, 16, 16, 4
    Cout, KH, KW = 8, 3, 3

    key = jax.random.PRNGKey(0)
    kx, kwgt, kb, kx2 = jax.random.split(key, 4)

    x = jax.random.normal(kx, (N, H, W, Cin), dtype=jnp.float32)

    # Deterministic PyTorch-like init: U(-k, k), k = 1/sqrt(Cin*KH*KW)
    fan_in = Cin * KH * KW
    bound = 1.0 / (fan_in ** 0.5)
    weight = jax.random.uniform(kwgt, (KH, KW, Cin, Cout), jnp.float32, -bound, bound)
    bias = jax.random.uniform(kb, (Cout,), jnp.float32, -bound, bound)

    # mode == "full" (uses the module's configured padding), f32
    y_full = jax.block_until_ready(
        sige_conv2d_nhwc(x, weight, bias, padding=(1, 1), mode="full"))
    ref_full = _reference_conv_nhwc(x, weight, bias, (1, 1))
    assert y_full.shape == (N, H, W, Cout)
    assert jnp.allclose(y_full, ref_full, atol=1e-3, rtol=1e-3)

    # mode == "sparse" (padding forced to (0, 0)), f32
    y_sparse = jax.block_until_ready(
        sige_conv2d_nhwc(x, weight, bias, padding=(1, 1), mode="sparse"))
    ref_sparse = _reference_conv_nhwc(x, weight, bias, (0, 0))
    assert y_sparse.shape == (N, H - KH + 1, W - KW + 1, Cout)
    assert jnp.allclose(y_sparse, ref_sparse, atol=1e-3, rtol=1e-3)

    # Larger spatial size -> multiple row tiles per batch element: exercises the
    # double-buffered halo DMA + lookahead prefetch path.
    x2 = jax.random.normal(kx2, (N, 32, 32, Cin), dtype=jnp.float32)
    y2 = jax.block_until_ready(
        sige_conv2d_nhwc(x2, weight, bias, padding=(1, 1), mode="full", row_tile=8))
    ref2 = _reference_conv_nhwc(x2, weight, bias, (1, 1))
    assert y2.shape == (N, 32, 32, Cout)
    assert jnp.allclose(y2, ref2, atol=1e-3, rtol=1e-3)

    # NCHW adapter (PyTorch layout parity)
    y_nchw = jax.block_until_ready(
        sige_conv2d(jnp.transpose(x, (0, 3, 1, 2)), weight, bias,
                    padding=(1, 1), mode="full"))
    assert jnp.allclose(y_nchw, jnp.transpose(y_full, (0, 3, 1, 2)),
                        atol=1e-3, rtol=1e-3)

    # bf16 compute path (native v6e/v7x MXU): bf16 inputs, f32 accumulation, f32 out
    y_bf16 = jax.block_until_ready(
        sige_conv2d_nhwc(x, weight, bias, padding=(1, 1), mode="full",
                         compute_dtype=jnp.bfloat16))
    ref_bf16 = lax.conv_general_dilated(
        x.astype(jnp.bfloat16), weight.astype(jnp.bfloat16),
        window_strides=(1, 1), padding=((1, 1), (1, 1)),
        dimension_numbers=("NHWC", "HWIO", "NHWC"),
        preferred_element_type=jnp.float32) + bias[None, None, None, :]
    assert y_bf16.shape == (N, H, W, Cout)
    assert jnp.allclose(y_bf16, ref_bf16, atol=5e-2, rtol=5e-2)

    print("KERNEL_OK")
</pallas_src>

<mosaic_0001>
module attributes {stable_mosaic.version = 11 : i64} {
  func.func @_sige_conv2d_kernel(%arg0: i32, %arg1: i32, %arg2: memref<2x18x16x128xf32, #tpu.memory_space<any>>, %arg3: memref<3x128x128xf32, #tpu.memory_space<vmem>>, %arg4: memref<1x128xf32, #tpu.memory_space<vmem>>, %arg5: memref<1x256x128xf32, #tpu.memory_space<vmem>>, %arg6: memref<2x18x16x128xf32, #tpu.memory_space<vmem>>, %arg7: memref<2x!tpu.dma_semaphore, #tpu.memory_space<semaphore_mem>>) attributes {dimension_semantics = [#tpu.dimension_semantics<parallel>, #tpu.dimension_semantics<arbitrary>], iteration_bounds = array<i64: 2, 1>, scalar_prefetch = 0 : i64, scratch_operands = 2 : i64, tpu.core_type = #tpu.core_type<tc>, window_params = [{}, {pipeline_mode = #tpu.pipeline_mode<synchronous>, transform_indices = @transform_1, window_bounds = array<i64: 3, 128, 128>}, {pipeline_mode = #tpu.pipeline_mode<synchronous>, transform_indices = @transform_2, window_bounds = array<i64: 1, 128>}, {transform_indices = @transform_3, window_bounds = array<i64: 1, 256, 128>}]} {
    %c1_i32 = arith.constant 1 : i32
    %0 = arith.andi %arg1, %c1_i32 : i32
    %c0_i32 = arith.constant 0 : i32
    %1 = arith.cmpi eq, %arg1, %c0_i32 : i32
    %2 = arith.extui %1 : i1 to i32
    %c0_i32_0 = arith.constant 0 : i32
    %3 = arith.cmpi ne, %2, %c0_i32_0 : i32
    scf.if %3 {
      %c16_i32 = arith.constant 16 : i32
      %43 = arith.muli %arg1, %c16_i32 : i32
      %c0_i32_32 = arith.constant 0 : i32
      %c0_i32_33 = arith.constant 0 : i32
      %44 = tpu.memref_slice %arg2[%arg0, %43, %c0_i32_32, %c0_i32_33] : memref<2x18x16x128xf32, #tpu.memory_space<any>> -> memref<1x18x16x128xf32, #tpu.memory_space<any>>
      %45 = tpu.memref_squeeze %44 : memref<1x18x16x128xf32, #tpu.memory_space<any>> -> memref<18x16x128xf32, #tpu.memory_space<any>>
      %c0_i32_34 = arith.constant 0 : i32
      %c0_i32_35 = arith.constant 0 : i32
      %c0_i32_36 = arith.constant 0 : i32
      %46 = tpu.memref_slice %arg6[%0, %c0_i32_34, %c0_i32_35, %c0_i32_36] : memref<2x18x16x128xf32, #tpu.memory_space<vmem>> -> memref<1x18x16x128xf32, #tpu.memory_space<vmem>>
      %47 = tpu.memref_squeeze %46 : memref<1x18x16x128xf32, #tpu.memory_space<vmem>> -> memref<18x16x128xf32, #tpu.memory_space<vmem>>
      %48 = tpu.memref_slice %arg7[%0] : memref<2x!tpu.dma_semaphore, #tpu.memory_space<semaphore_mem>> -> memref<1x!tpu.dma_semaphore, #tpu.memory_space<semaphore_mem>>
      %49 = tpu.memref_squeeze %48 : memref<1x!tpu.dma_semaphore, #tpu.memory_space<semaphore_mem>> -> memref<!tpu.dma_semaphore, #tpu.memory_space<semaphore_mem>>
      tpu.enqueue_dma source(%45 : memref<18x16x128xf32, #tpu.memory_space<any>>) target(%47 : memref<18x16x128xf32, #tpu.memory_space<vmem>>) target_semaphore(%49 : memref<!tpu.dma_semaphore, #tpu.memory_space<semaphore_mem>>)
    } else {
    }
    %c1_i32_1 = arith.constant 1 : i32
    %4 = arith.addi %arg1, %c1_i32_1 : i32
    %c1_i32_2 = arith.constant 1 : i32
    %5 = arith.cmpi slt, %4, %c1_i32_2 : i32
    %6 = arith.extui %5 : i1 to i32
    %c0_i32_3 = arith.constant 0 : i32
    %7 = arith.cmpi ne, %6, %c0_i32_3 : i32
    scf.if %7 {
      %c1_i32_32 = arith.constant 1 : i32
      %43 = arith.addi %arg1, %c1_i32_32 : i32
      %c1_i32_33 = arith.constant 1 : i32
      %44 = arith.subi %c1_i32_33, %0 : i32
      %c16_i32 = arith.constant 16 : i32
      %45 = arith.muli %43, %c16_i32 : i32
      %c0_i32_34 = arith.constant 0 : i32
      %c0_i32_35 = arith.constant 0 : i32
      %46 = tpu.memref_slice %arg2[%arg0, %45, %c0_i32_34, %c0_i32_35] : memref<2x18x16x128xf32, #tpu.memory_space<any>> -> memref<1x18x16x128xf32, #tpu.memory_space<any>>
      %47 = tpu.memref_squeeze %46 : memref<1x18x16x128xf32, #tpu.memory_space<any>> -> memref<18x16x128xf32, #tpu.memory_space<any>>
      %c0_i32_36 = arith.constant 0 : i32
      %c0_i32_37 = arith.constant 0 : i32
      %c0_i32_38 = arith.constant 0 : i32
      %48 = tpu.memref_slice %arg6[%44, %c0_i32_36, %c0_i32_37, %c0_i32_38] : memref<2x18x16x128xf32, #tpu.memory_space<vmem>> -> memref<1x18x16x128xf32, #tpu.memory_space<vmem>>
      %49 = tpu.memref_squeeze %48 : memref<1x18x16x128xf32, #tpu.memory_space<vmem>> -> memref<18x16x128xf32, #tpu.memory_space<vmem>>
      %50 = tpu.memref_slice %arg7[%44] : memref<2x!tpu.dma_semaphore, #tpu.memory_space<semaphore_mem>> -> memref<1x!tpu.dma_semaphore, #tpu.memory_space<semaphore_mem>>
      %51 = tpu.memref_squeeze %50 : memref<1x!tpu.dma_semaphore, #tpu.memory_space<semaphore_mem>> -> memref<!tpu.dma_semaphore, #tpu.memory_space<semaphore_mem>>
      tpu.enqueue_dma source(%47 : memref<18x16x128xf32, #tpu.memory_space<any>>) target(%49 : memref<18x16x128xf32, #tpu.memory_space<vmem>>) target_semaphore(%51 : memref<!tpu.dma_semaphore, #tpu.memory_space<semaphore_mem>>)
    } else {
    }
    %c0_i32_4 = arith.constant 0 : i32
    %c0_i32_5 = arith.constant 0 : i32
    %c0_i32_6 = arith.constant 0 : i32
    %8 = tpu.memref_slice %arg2[%arg0, %c0_i32_4, %c0_i32_5, %c0_i32_6] : memref<2x18x16x128xf32, #tpu.memory_space<any>> -> memref<1x18x16x128xf32, #tpu.memory_space<any>>
    %9 = tpu.memref_squeeze %8 : memref<1x18x16x128xf32, #tpu.memory_space<any>> -> memref<18x16x128xf32, #tpu.memory_space<any>>
    %c0_i32_7 = arith.constant 0 : i32
    %c0_i32_8 = arith.constant 0 : i32
    %c0_i32_9 = arith.constant 0 : i32
    %10 = tpu.memref_slice %arg6[%0, %c0_i32_7, %c0_i32_8, %c0_i32_9] : memref<2x18x16x128xf32, #tpu.memory_space<vmem>> -> memref<1x18x16x128xf32, #tpu.memory_space<vmem>>
    %11 = tpu.memref_squeeze %10 : memref<1x18x16x128xf32, #tpu.memory_space<vmem>> -> memref<18x16x128xf32, #tpu.memory_space<vmem>>
    %12 = tpu.memref_slice %arg7[%0] : memref<2x!tpu.dma_semaphore, #tpu.memory_space<semaphore_mem>> -> memref<1x!tpu.dma_semaphore, #tpu.memory_space<semaphore_mem>>
    %13 = tpu.memref_squeeze %12 : memref<1x!tpu.dma_semaphore, #tpu.memory_space<semaphore_mem>> -> memref<!tpu.dma_semaphore, #tpu.memory_space<semaphore_mem>>
    tpu.wait_dma2 semaphore(%13 : memref<!tpu.dma_semaphore, #tpu.memory_space<semaphore_mem>>) src(%9 : memref<18x16x128xf32, #tpu.memory_space<any>>) dst(%11 : memref<18x16x128xf32, #tpu.memory_space<vmem>>)
    %14 = arith.index_cast %0 : i32 to index
    %c0 = arith.constant 0 : index
    %c0_10 = arith.constant 0 : index
    %c0_11 = arith.constant 0 : index
    %15 = vector.load %arg6[%14, %c0, %c0_10, %c0_11] : memref<2x18x16x128xf32, #tpu.memory_space<vmem>>, vector<1x16x16x128xf32>
    %16 = vector.shape_cast %15 : vector<1x16x16x128xf32> to vector<16x16x128xf32>
    %17 = vector.shape_cast %16 : vector<16x16x128xf32> to vector<256x128xf32>
    %c0_12 = arith.constant 0 : index
    %c0_13 = arith.constant 0 : index
    %c0_14 = arith.constant 0 : index
    %18 = vector.load %arg3[%c0_12, %c0_13, %c0_14] : memref<3x128x128xf32, #tpu.memory_space<vmem>>, vector<1x128x128xf32>
    %19 = vector.shape_cast %18 : vector<1x128x128xf32> to vector<128x128xf32>
    %cst = arith.constant dense<0.000000e+00> : vector<256x128xf32>
    %20 = tpu.matmul %17, %19, %cst {dimension_numbers = #tpu.dot_dimension_numbers<[1], [0], [0], [1], [0, 0, 1, 1], [], []>} : vector<256x128xf32>, vector<128x128xf32>, vector<256x128xf32> -> vector<256x128xf32>
    %21 = arith.index_cast %0 : i32 to index
    %c1 = arith.constant 1 : index
    %c0_15 = arith.constant 0 : index
    %c0_16 = arith.constant 0 : index
    %22 = vector.load %arg6[%21, %c1, %c0_15, %c0_16] : memref<2x18x16x128xf32, #tpu.memory_space<vmem>>, vector<1x16x16x128xf32>
    %23 = vector.shape_cast %22 : vector<1x16x16x128xf32> to vector<16x16x128xf32>
    %24 = vector.shape_cast %23 : vector<16x16x128xf32> to vector<256x128xf32>
    %c1_17 = arith.constant 1 : index
    %c0_18 = arith.constant 0 : index
    %c0_19 = arith.constant 0 : index
    %25 = vector.load %arg3[%c1_17, %c0_18, %c0_19] : memref<3x128x128xf32, #tpu.memory_space<vmem>>, vector<1x128x128xf32>
    %26 = vector.shape_cast %25 : vector<1x128x128xf32> to vector<128x128xf32>
    %cst_20 = arith.constant dense<0.000000e+00> : vector<256x128xf32>
    %27 = tpu.matmul %24, %26, %cst_20 {dimension_numbers = #tpu.dot_dimension_numbers<[1], [0], [0], [1], [0, 0, 1, 1], [], []>} : vector<256x128xf32>, vector<128x128xf32>, vector<256x128xf32> -> vector<256x128xf32>
    %28 = arith.addf %20, %27 : vector<256x128xf32>
    %29 = arith.index_cast %0 : i32 to index
    %c2 = arith.constant 2 : index
    %c0_21 = arith.constant 0 : index
    %c0_22 = arith.constant 0 : index
    %30 = vector.load %arg6[%29, %c2, %c0_21, %c0_22] : memref<2x18x16x128xf32, #tpu.memory_space<vmem>>, vector<1x16x16x128xf32>
    %31 = vector.shape_cast %30 : vector<1x16x16x128xf32> to vector<16x16x128xf32>
    %32 = vector.shape_cast %31 : vector<16x16x128xf32> to vector<256x128xf32>
    %c2_23 = arith.constant 2 : index
    %c0_24 = arith.constant 0 : index
    %c0_25 = arith.constant 0 : index
    %33 = vector.load %arg3[%c2_23, %c0_24, %c0_25] : memref<3x128x128xf32, #tpu.memory_space<vmem>>, vector<1x128x128xf32>
    %34 = vector.shape_cast %33 : vector<1x128x128xf32> to vector<128x128xf32>
    %cst_26 = arith.constant dense<0.000000e+00> : vector<256x128xf32>
    %35 = tpu.matmul %32, %34, %cst_26 {dimension_numbers = #tpu.dot_dimension_numbers<[1], [0], [0], [1], [0, 0, 1, 1], [], []>} : vector<256x128xf32>, vector<128x128xf32>, vector<256x128xf32> -> vector<256x128xf32>
    %36 = arith.addf %28, %35 : vector<256x128xf32>
    %c0_27 = arith.constant 0 : index
    %c0_28 = arith.constant 0 : index
    %37 = vector.load %arg4[%c0_27, %c0_28] : memref<1x128xf32, #tpu.memory_space<vmem>>, vector<1x128xf32>
    %38 = vector.broadcast %37 : vector<1x128xf32> to vector<256x128xf32>
    %39 = arith.addf %36, %38 : vector<256x128xf32>
    %c0_29 = arith.constant 0 : index
    %c0_30 = arith.constant 0 : index
    %c0_31 = arith.constant 0 : index
    %40 = vector.load %arg5[%c0_29, %c0_30, %c0_31] : memref<1x256x128xf32, #tpu.memory_space<vmem>>, vector<1x256x128xf32>
    %41 = vector.shape_cast %40 : vector<1x256x128xf32> to vector<256x128xf32>
    %42 = vector.shape_cast %39 : vector<256x128xf32> to vector<1x256x128xf32>
    tpu.vector_store %arg5[%c0_29, %c0_30, %c0_31], %42 {strides = array<i32>} : memref<1x256x128xf32, #tpu.memory_space<vmem>>, vector<1x256x128xf32>,
    return
  }
  func.func @transform_1(%arg0: i32, %arg1: i32) -> (i32, i32, i32) {
    %c0_i32 = arith.constant 0 : i32
    %c0_i32_0 = arith.constant 0 : i32
    %c0_i32_1 = arith.constant 0 : i32
    %c0_i32_2 = arith.constant 0 : i32
    return %c0_i32, %c0_i32_0, %c0_i32_1 : i32, i32, i32
  }
  func.func @transform_2(%arg0: i32, %arg1: i32) -> (i32, i32) {
    %c0_i32 = arith.constant 0 : i32
    %c0_i32_0 = arith.constant 0 : i32
    %c0_i32_1 = arith.constant 0 : i32
    return %c0_i32, %c0_i32_0 : i32, i32
  }
  func.func @transform_3(%arg0: i32, %arg1: i32) -> (i32, i32, i32) {
    %c0_i32 = arith.constant 0 : i32
    %c0_i32_0 = arith.constant 0 : i32
    return %arg0, %arg1, %c0_i32 : i32, i32, i32
  }
}

</mosaic_0001>

<bundles_post_ra>
// kernel: tpu_custom_call.1
= control target key start
LH: loop header
LB: loop body
LE: loop exit
PB: predicated region body
PF: predicated region fallthrough
CT: control target
= control target key end

     0   :  { %8 = vsyncpa [#allocation5], 0  ;;  %s1690_s0 = inlined_call_operand.hbm [shape: f32[2,18,16,128], index: 0, kind: input, shape index: {}]   ;;  %s1691_s1 = inlined_call_operand.hbm [shape: f32[3,128,128], index: 1, kind: input, shape index: {}]   ;;  %s1692_s2 = inlined_call_operand.vmem [shape: f32[1,128], index: 2, kind: input, shape index: {}]   ;;  %s1693_s3 = inlined_call_operand.hbm [shape: f32[2,256,128], index: 3, kind: output, shape index: {}]  }
   0x1   :  { %9 = vsyncpa [#allocation6], 0 }
   0x2   :  { %11 = vsyncpa [#allocation6 + $0x1], 0  ;;  %s1297_s12 = smov 0   ;;  %s1299_s13 = smov 0  }
   0x3   :  { %s1301_s14 = smov 0   ;;  %s1303_s15 = smov 0  }
   0x4   :  { %s1305_s16 = smov 0   ;;  %s1307_s17 = smov 0  }
   0x5 LB: > { %s932_s18 = sadd.s32 4294967295, %s1269_s17   ;;  %s933_s19 = sadd.s32 4294967294, %s1269_s17   ;;  %s1269_s17 = sphi %s1307_s17, %s17_s17   ;;  %s1265_s16 = sphi %s1305_s16, %s1700_s16   ;;  %s1261_s15 = sphi %s1303_s15, %s1699_s15   ;;  %s1257_s14 = sphi %s1301_s14, %s1698_s14   ;;  %s1253_s13 = sphi %s1299_s13, %s1697_s13   ;;  %s1249_s12 = sphi %s1297_s12, %s1696_s12  }
   0x6   : > { %s29_s20 = sadd.s32 1, %s1265_s16  ;;  %s80_s21 = sadd.s32 1, %s1257_s14 }
   0x7   : > { %p31_p0 = scmp.ge.s32.totalorder %s29_s20, 2  ;;  %p90_p1 = scmp.ne.s32.totalorder %s1257_s14, %s1253_s13 }
   0x8   : > { %p91_p2 = scmp.eq.s32.totalorder %s932_s18, 1  ;;  %p96_p3 = scmp.ne.s32.totalorder %s1253_s13, %s1249_s12 }
   0x9   : > { %s1702_s20 = smov (%p31_p0, %s29_s20), 0  ;;  %p97_p5 = scmp.eq.s32.totalorder %s933_s19, 1 }
   0xa   : > { %p1337_p4 = por %p91_p2, %p90_p1  ;;  %s75_s23 = ssub.s32 %s1265_s16, %s1702_s20 }
   0xb   : > { %p934_p6 = scmp.ge.s32.totalorder %s1269_s17, 1  ;;  %p78_p7 = scmp.eq.s32.totalorder %s75_s23, 0 }
   0xc   : > { %p1344_p8 = por %p97_p5, %p96_p3  ;;  %p104_p9 = scmp.lt.s32.totalorder %s1269_s17, 3 }
   0xd   : > { %s1350_s25 = scalar_select %p78_p7, %s1257_s14, %s80_s21  }
   0xe   : > { %p105_p10 = pnand %p934_p6, %p104_p9  ;;  %p1073_p11 = scmp.eq.s32.totalorder %s932_s18, 0 }
   0xf   : > { %s115_s28 = sshll.u32 %s1691_s1, 4  ;;  %s1271_s29 = smov [#allocation4]   ;;  %s116_s28 = int_to_ptr.hbm [resolvable:$true] %s115_s28 }
  0x10   : > { %p1065_p12 = pneg %p105_p10  ;;  %s117_s30 = sshll.u32 %s1271_s29, 4  ;;  %s118_s30 = int_to_ptr.vmem [resolvable:$true] %s117_s30 }
  0x11   : > { %s1272_s4 = smov 128   ;;  %s1273_s5 = smov 8  }
  0x12   : > { %p1066_p13 = pnand %p1073_p11, %p1065_p12  ;;  %136 = sbr.rel (%p105_p10) target bundleno = 397 (0x18d), region = 28 }
  0x14   : > { %1068 = dma.hbm_to_vmem [thread:$0]  (!%p1066_p13), %s116_s28, 6144, %s118_s30, [#allocation5], %s1272_s4, %s1272_s4, %s1273_s5  }
  0x17   : > { %1238 = dma.done.wait (%p1073_p11), [#allocation5], 6144  }
  0x18   : > { %1240 = vsyncadd (%p1073_p11), [#allocation5], 4294961152  ;;  %s151_s6 = sand.u32 1, %s1253_s13   ;;  %s162_s7 = smul.u32 288, %s1261_s15 }
  0x19   : > { %s938_s8 = sshll.u32 %s151_s6, 8  ;;  %s1274_s19 = smov [#allocation2]  }
  0x1a   : > { %s164_s11 = scalar_lea.hbm %s1690_s0, %s162_s7  ;;  %s177_s21 = sshll.u32 %s1274_s19, 4  ;;  %s178_s21 = int_to_ptr.vmem [resolvable:$true] %s177_s21 }
  0x1b   : > { %s175_s18 = sshll.u32 %s164_s11, 4  ;;  %s1165_s29 = scalar_lea.hbm %s1690_s0, 576  ;;  %s176_s18 = int_to_ptr.hbm [resolvable:$true] %s175_s18 }
  0x1c   : > { %s1161_s23 = sshra.s32 %s176_s18, 4  ;;  %s1162_s23 = int_to_ptr.hbm [resolvable:$true] %s1161_s23 }
  0x1d   : > { %s1163_s26 = scalar_lea.hbm %s1162_s23, 288  ;;  %p1166_p1 = scmp.lt.s32.totalorder %s1162_s23, %s1690_s0 }
  0x1e   : > { %p1164_p0 = scmp.ne.s32.totalorder %s1162_s23, %s1163_s26  ;;  %p1167_p2 = scmp.lt.s32.totalorder %s1165_s29, %s1163_s26 }
  0x20   : > { %p1168_p3 = por %p1167_p2, %p1166_p1 }
  0x22   : > { %p1169_p5 = pnand %p1168_p3, %p1164_p0 }
  0x24   : > { %1172 = shalt.err (!%p1169_p5)  }
  0x25   : > { %180 = dma.hbm_to_vmem [thread:$0]  %s176_s18, 4608, %s178_s21, [#allocation3] }
  0x26   : > { %s1368_s5 = scalar_lea.vmem [#allocation7], %s938_s8 }
  0x27   : > { %1241 = dma.done.wait [#allocation3], 4608 }
  0x28   : > { %1242 = vsyncadd [#allocation3], 4294962688  ;;  %v313_v0 = vld [vmem:[#allocation4 + $0xf8] sm:$0xff]  ;;  %v312_v2 = vld [vmem:[#allocation4 + $0xf0] sm:$0xff]  ;;  %s1010_s9 = sshll.u32 %s1261_s15, 8  ;;  %s819_s15 = sshll.u32 %s1368_s5, 4  ;;  %s820_s15 = int_to_ptr.vmem [resolvable:$true] %s819_s15 }
  0x29   : > { %v1370_v1 = vld [vmem:[#allocation4 + $0x178] sm:$0xff]  ;;  %1011 = vmatpush.msra.mxu3 %v313_v0  ;;  %v1373_v3 = vld [vmem:[#allocation4 + $0x170] sm:$0xff]  ;;  %314 = vmatpush.msra.mxu0 %v313_v0  ;;  %v311_v5 = vld [vmem:[#allocation4 + $0xe8] sm:$0xff]  ;;  %s818_s18 = scalar_lea.hbm %s1693_s3, %s1010_s9  ;;  %s805_s21 = scalar_lea.sflag [#allocation6], %s151_s6 }
  0x2a   : > { %591 = vmatpush.msra.mxu2 %v1370_v1  ;;  %v1375_v4 = vld [vmem:[#allocation4 + $0x78] sm:$0xff]  ;;  %v1378_v6 = vld [vmem:[#allocation4 + $0x168] sm:$0xff]  ;;  %v1380_v7 = vld [vmem:[#allocation4 + $0x70] sm:$0xff]  ;;  %s821_s19 = sshll.u32 %s818_s18, 4  ;;  %s1205_s29 = scalar_lea.hbm %s1693_s3, 512  ;;  %s822_s19 = int_to_ptr.hbm [resolvable:$true] %s821_s19 }
  0x2b   : > { %427 = vmatpush.msra.mxu1 %v1375_v4  ;;  %1012 = vmatpush.msra.mxu3 %v312_v2  ;;  %v1383_v8 = vld [vmem:[#allocation4 + $0x68] sm:$0xff]  ;;  %v310_v9 = vld [vmem:[#allocation4 + $0xe0] sm:$0xff]  ;;  %v309_v12 = vld [vmem:[#allocation4 + $0xd8] sm:$0xff]  ;;  %s1199_s23 = sshra.s32 %s822_s19, 4  ;;  %s1200_s23 = int_to_ptr.hbm [resolvable:$true] %s1199_s23 }
  0x2c   : > { %592 = vmatpush.msra.mxu2 %v1373_v3  ;;  %315 = vmatpush.msra.mxu0 %v312_v2  ;;  %v1386_v10 = vld [vmem:[#allocation4 + $0x160] sm:$0xff]  ;;  %v1392_v13 = vld [vmem:[#allocation4 + $0x158] sm:$0xff]  ;;  %v308_v15 = vld [vmem:[#allocation4 + $0xd0] sm:$0xff]  ;;  %s1201_s26 = scalar_lea.hbm %s1200_s23, 256  ;;  %p1206_p10 = scmp.lt.s32.totalorder %s1200_s23, %s1693_s3 }
  0x2d   : > { %428 = vmatpush.msra.mxu1 %v1380_v7  ;;  %1013 = vmatpush.msra.mxu3 %v311_v5  ;;  %v1389_v11 = vld [vmem:[#allocation4 + $0x60] sm:$0xff]  ;;  %v1395_v14 = vld [vmem:[#allocation4 + $0x58] sm:$0xff]  ;;  %v1398_v16 = vld [vmem:[#allocation4 + $0x150] sm:$0xff]  ;;  %p1202_p6 = scmp.ne.s32.totalorder %s1200_s23, %s1201_s26  ;;  %p1207_p11 = scmp.lt.s32.totalorder %s1205_s29, %s1201_s26 }
  0x2e   : > { %593 = vmatpush.msra.mxu2 %v1378_v6  ;;  %316 = vmatpush.msra.mxu0 %v311_v5  ;;  %v1401_v17 = vld [vmem:[#allocation4 + $0x50] sm:$0xff]  ;;  %v307_v18 = vld [vmem:[#allocation4 + $0xc8] sm:$0xff]  ;;  %v306_v21 = vld [vmem:[#allocation4 + $0xc0] sm:$0xff] }
  0x2f   : > { %429 = vmatpush.msra.mxu1 %v1383_v8  ;;  %1014 = vmatpush.msra.mxu3 %v310_v9  ;;  %v1404_v19 = vld [vmem:[#allocation4 + $0x148] sm:$0xff]  ;;  %v1410_v22 = vld [vmem:[#allocation4 + $0x140] sm:$0xff]  ;;  %v305_v24 = vld [vmem:[#allocation4 + $0xb8] sm:$0xff]  ;;  %p1203_p7 = pnand %p1202_p6, %p1337_p4  ;;  %p1208_p12 = por %p1207_p11, %p1206_p10 }
  0x30   : > { %594 = vmatpush.msra.mxu2 %v1386_v10  ;;  %317 = vmatpush.msra.mxu0 %v310_v9  ;;  %v1407_v20 = vld [vmem:[#allocation4 + $0x48] sm:$0xff]  ;;  %v1413_v23 = vld [vmem:[#allocation4 + $0x40] sm:$0xff]  ;;  %v1416_v25 = vld [vmem:[#allocation4 + $0x138] sm:$0xff] }
  0x31   : > { %430 = vmatpush.msra.mxu1 %v1389_v11  ;;  %1015 = vmatpush.msra.mxu3 %v309_v12  ;;  %v1419_v26 = vld [vmem:[#allocation4 + $0x38] sm:$0xff]  ;;  %v304_v27 = vld [vmem:[#allocation4 + $0xb0] sm:$0xff]  ;;  %v303_v30 = vld [vmem:[#allocation4 + $0xa8] sm:$0xff]  ;;  %p1204_p9 = pneg %p1203_p7 }
  0x32   : > { %595 = vmatpush.msra.mxu2 %v1392_v13  ;;  %318 = vmatpush.msra.mxu0 %v309_v12  ;;  %v1422_v28 = vld [vmem:[#allocation4 + $0x130] sm:$0xff]  ;;  %v1428_v31 = vld [vmem:[#allocation4 + $0x128] sm:$0xff]  ;;  %v302_v33 = vld [vmem:[#allocation4 + $0xa0] sm:$0xff] }
  0x33   : > { %431 = vmatpush.msra.mxu1 %v1395_v14  ;;  %1016 = vmatpush.msra.mxu3 %v308_v15  ;;  %v1425_v29 = vld [vmem:[#allocation4 + $0x30] sm:$0xff]  ;;  %v1431_v32 = vld [vmem:[#allocation4 + $0x28] sm:$0xff]  ;;  %v1434_v34 = vld [vmem:[#allocation4 + $0x120] sm:$0xff]  ;;  %p1209_p13 = pnand %p1208_p12, %p1204_p9 }
  0x34   : > { %596 = vmatpush.msra.mxu2 %v1398_v16  ;;  %319 = vmatpush.msra.mxu0 %v308_v15  ;;  %v1437_v35 = vld [vmem:[#allocation4 + $0x20] sm:$0xff]  ;;  %v301_v36 = vld [vmem:[#allocation4 + $0x98] sm:$0xff]  ;;  %v300_v39 = vld [vmem:[#allocation4 + $0x90] sm:$0xff] }
  0x35   : > { %432 = vmatpush.msra.mxu1 %v1401_v17  ;;  %1017 = vmatpush.msra.mxu3 %v307_v18  ;;  %v1440_v37 = vld [vmem:[#allocation4 + $0x118] sm:$0xff]  ;;  %v1446_v40 = vld [vmem:[#allocation4 + $0x110] sm:$0xff]  ;;  %v299_v42 = vld [vmem:[#allocation4 + $0x88] sm:$0xff] }
  0x36   : > { %597 = vmatpush.msra.mxu2 %v1404_v19  ;;  %320 = vmatpush.msra.mxu0 %v307_v18  ;;  %v1443_v38 = vld [vmem:[#allocation4 + $0x18] sm:$0xff]  ;;  %v249_v41 = vld [vmem:[#allocation4 + $0x10] sm:$0xff]  ;;  %v1450_v43 = vld [vmem:[#allocation4 + $0x108] sm:$0xff] }
  0x37   : > { %433 = vmatpush.msra.mxu1 %v1407_v20  ;;  %1018 = vmatpush.msra.mxu3 %v306_v21  ;;  %v248_v44 = vld [vmem:[#allocation4 + $0x8] sm:$0xff]  ;;  %v298_v45 = vld [vmem:[#allocation4 + $0x80] sm:$0xff]  ;;  %v1456_v47 = vld [vmem:[#allocation2 + $0xd0] sm:$0xff] }
  0x38   : > { %598 = vmatpush.msra.mxu2 %v1410_v22  ;;  %321 = vmatpush.msra.mxu0 %v306_v21  ;;  %v1453_v46 = vld [vmem:[#allocation4 + $0x100] sm:$0xff]  ;;  %v939_v50 = vld [vmem:[#allocation2 + $0x10] sm:$0xff]  ;;  %v1462_v52 = vld [vmem:[#allocation2 + $0xd8] sm:$0xff] }
  0x39   : > { %434 = vmatpush.msra.mxu1 %v1413_v23  ;;  %1019 = vmatpush.msra.mxu3 %v305_v24  ;;  %v971_v48 = vld [vmem:[#allocation2 + $0x20] sm:$0xff]  ;;  %v972_v53 = vld [vmem:[#allocation2 + $0x28] sm:$0xff]  ;;  %v940_v54 = vld [vmem:[#allocation2 + $0x18] sm:$0xff] }
  0x3a   : > { %599 = vmatpush.msra.mxu2 %v1416_v25  ;;  %322 = vmatpush.msra.mxu0 %v305_v24  ;;  %v247_v49 = vld [vmem:[#allocation4] sm:$0xff]  ;;  %v216_v55 = vld [vmem:[#allocation2 + $0x8] sm:$0xff]  ;;  %v973_v57 = vld [vmem:[#allocation2 + $0x30] sm:$0xff] }
  0x3b   : > { %435 = vmatpush.msra.mxu1 %v1419_v26  ;;  %1020 = vmatpush.msra.mxu3 %v304_v27  ;;  %v215_v51 = vld [vmem:[#allocation2] sm:$0xff]  ;;  %v1476_v58 = vld [vmem:[#allocation2 + $0xe8] sm:$0xff]  ;;  %v974_v59 = vld [vmem:[#allocation2 + $0x38] sm:$0xff] }
  0x3c   : > { %600 = vmatpush.msra.mxu2 %v1422_v28  ;;  %323 = vmatpush.msra.mxu0 %v304_v27  ;;  %v1469_v56 = vld [vmem:[#allocation2 + $0xe0] sm:$0xff]  ;;  %v1482_v60 = vld [vmem:[#allocation2 + $0xf0] sm:$0xff]  ;;  %v1487_v62 = vld [vmem:[#allocation2 + $0xf8] sm:$0xff] }
  0x3d   : > { %436 = vmatpush.msra.mxu1 %v1425_v29  ;;  %1021 = vmatpush.msra.mxu3 %v303_v30  ;;  %v975_v61 = vld [vmem:[#allocation2 + $0x40] sm:$0xff]  ;;  %v976_v63 = vld [vmem:[#allocation2 + $0x48] sm:$0xff]  ;;  %v982_v9 = vld [vmem:[#allocation2 + $0x78] sm:$0xff] }
  0x3e   : > { %601 = vmatpush.msra.mxu2 %v1428_v31  ;;  %324 = vmatpush.msra.mxu0 %v303_v30  ;;  %v1494_v0 = vld [vmem:[#allocation2 + $0x100] sm:$0xff]  ;;  %v1501_v2 = vld [vmem:[#allocation2 + $0x108] sm:$0xff]  ;;  %v985_v12 = vld [vmem:[#allocation2 + $0x90] sm:$0xff] }
  0x3f   : > { %437 = vmatpush.msra.mxu1 %v1431_v32  ;;  %1022 = vmatpush.msra.mxu3 %v302_v33  ;;  %v979_v5 = vld [vmem:[#allocation2 + $0x60] sm:$0xff]  ;;  %v989_v30 = vld [vmem:[#allocation2 + $0xb0] sm:$0xff] }
  0x40   : > { %602 = vmatpush.msra.mxu2 %v1434_v34  ;;  %325 = vmatpush.msra.mxu0 %v302_v33  ;;  %v1526_v18 = vld [vmem:[%s1692_s2] ss:$0 sm:$0xff] }
  0x41   : > { %438 = vmatpush.msra.mxu1 %v1437_v35  ;;  %1023 = vmatpush.msra.mxu3 %v301_v36 }
  0x42   : > { %603 = vmatpush.msra.mxu2 %v1440_v37  ;;  %326 = vmatpush.msra.mxu0 %v301_v36 }
  0x43   : > { %439 = vmatpush.msra.mxu1 %v1443_v38  ;;  %1024 = vmatpush.msra.mxu3 %v300_v39 }
  0x44   : > { %604 = vmatpush.msra.mxu2 %v1446_v40  ;;  %327 = vmatpush.msra.mxu0 %v300_v39 }
  0x45   : > { %440 = vmatpush.msra.mxu1 %v249_v41  ;;  %1025 = vmatpush.msra.mxu3 %v299_v42 }
  0x46   : > { %605 = vmatpush.msra.mxu2 %v1450_v43  ;;  %328 = vmatpush.msra.mxu0 %v299_v42 }
  0x47   : > { %441 = vmatpush.msra.mxu1 %v248_v44  ;;  %1026 = vmatpush.msra.mxu3 %v298_v45 }
  0x48   : > { %606 = vmatpush.msra.mxu2 %v1453_v46  ;;  %402 = vmatmul.f32.vlgmr.msra.gmra.mxu3 %v1456_v47 }
  0x49   : > { %607 = vmatmul.f32.vlgmr.msra.gmra.mxu2 %v971_v48  ;;  %1027 = vmatpush.msrb.mxu3 %v1375_v4  ;;  %v1508_v4 = vld [vmem:[#allocation2 + $0xc0] sm:$0xff] }
  0x4a   : > { %329 = vmatpush.msra.mxu0 %v298_v45  ;;  %442 = vmatpush.msra.mxu1 %v247_v49 }
  0x4b   : > { %330 = vmatmul.f32.vlgmr.msra.gmra.mxu0 %v939_v50  ;;  %1028 = vmatpush.msrb.mxu3 %v1380_v7  ;;  %v980_v7 = vld [vmem:[#allocation2 + $0x68] sm:$0xff] }
  0x4c   : > { %443 = vmatmul.f32.vlgmr.msra.gmra.mxu1 %v215_v51 }
  0x4d   : > { %1029 = vmatpush.msrb.mxu3 %v1383_v8  ;;  %v981_v8 = vld [vmem:[#allocation2 + $0x70] sm:$0xff] }
  0x4f   : > { %1030 = vmatpush.msrb.mxu3 %v1389_v11  ;;  %v984_v11 = vld [vmem:[#allocation2 + $0x88] sm:$0xff] }
  0x50   : > { %405 = vmatmul.f32.gmra.mxu3 %v1462_v52 }
  0x51   : > { %610 = vmatmul.f32.gmra.mxu2 %v972_v53  ;;  %1031 = vmatpush.msrb.mxu3 %v1395_v14  ;;  %v987_v14 = vld [vmem:[#allocation2 + $0xa0] sm:$0xff] }
  0x53   : > { %333 = vmatmul.f32.gmra.mxu0 %v940_v54  ;;  %1032 = vmatpush.msrb.mxu3 %v1401_v17 }
  0x54   : > { %446 = vmatmul.f32.gmra.mxu1 %v216_v55 }
  0x55   : > { %1033 = vmatpush.msrb.mxu3 %v1407_v20 }
  0x57   : > { %1034 = vmatpush.msrb.mxu3 %v1413_v23 }
  0x58   : > { %408 = vmatmul.f32.gmra.mxu3 %v1469_v56 }
  0x59   : > { %613 = vmatmul.f32.gmra.mxu2 %v973_v57  ;;  %1035 = vmatpush.msrb.mxu3 %v1419_v26 }
  0x5b   : > { %336 = vmatmul.f32.gmra.mxu0 %v971_v48  ;;  %1036 = vmatpush.msrb.mxu3 %v1425_v29 }
  0x5c   : > { %449 = vmatmul.f32.gmra.mxu1 %v939_v50 }
  0x5d   : > { %1037 = vmatpush.msrb.mxu3 %v1431_v32 }
  0x5f   : > { %1038 = vmatpush.msrb.mxu3 %v1437_v35 }
  0x60   : > { %411 = vmatmul.f32.gmra.mxu3 %v1476_v58 }
  0x61   : > { %616 = vmatmul.f32.gmra.mxu2 %v974_v59  ;;  %1039 = vmatpush.msrb.mxu3 %v1443_v38  ;;  %v990_v38 = vld [vmem:[#allocation2 + $0xb8] sm:$0xff] }
  0x63   : > { %339 = vmatmul.f32.gmra.mxu0 %v972_v53  ;;  %1040 = vmatpush.msrb.mxu3 %v249_v41 }
  0x64   : > { %452 = vmatmul.f32.gmra.mxu1 %v940_v54 }
  0x65   : > { %1041 = vmatpush.msrb.mxu3 %v248_v44 }
  0x67   : > { %1042 = vmatpush.msrb.mxu3 %v247_v49 }
  0x68   : > { %414 = vmatmul.f32.gmra.mxu3 %v1482_v60 }
  0x69   : > { %619 = vmatmul.f32.gmra.mxu2 %v975_v61  ;;  %1043 = vmatpush.msra.mxu3 %v1370_v1  ;;  %v977_v1 = vld [vmem:[#allocation2 + $0x50] sm:$0xff] }
  0x6b   : > { %342 = vmatmul.f32.gmra.mxu0 %v973_v57  ;;  %1044 = vmatpush.msra.mxu3 %v1373_v3  ;;  %v978_v3 = vld [vmem:[#allocation2 + $0x58] sm:$0xff] }
  0x6c   : > { %455 = vmatmul.f32.gmra.mxu1 %v971_v48 }
  0x6d   : > { %1045 = vmatpush.msra.mxu3 %v1378_v6  ;;  %v1513_v6 = vld [vmem:[#allocation2 + $0xc8] sm:$0xff] }
  0x6f   : > { %1046 = vmatpush.msra.mxu3 %v1386_v10  ;;  %v983_v10 = vld [vmem:[#allocation2 + $0x80] sm:$0xff] }
  0x70   : > { %417 = vmatmul.f32.gmra.mxu3 %v1487_v62 }
  0x71   : > { %622 = vmatmul.f32.gmra.mxu2 %v976_v63  ;;  %1047 = vmatpush.msra.mxu3 %v1392_v13  ;;  %v986_v13 = vld [vmem:[#allocation2 + $0x98] sm:$0xff] }
  0x73   : > { %345 = vmatmul.f32.gmra.mxu0 %v974_v59  ;;  %1048 = vmatpush.msra.mxu3 %v1398_v16 }
  0x74   : > { %458 = vmatmul.f32.gmra.mxu1 %v972_v53 }
  0x75   : > { %1049 = vmatpush.msra.mxu3 %v1404_v19 }
  0x77   : > { %1050 = vmatpush.msra.mxu3 %v1410_v22  ;;  %v988_v22 = vld [vmem:[#allocation2 + $0xa8] sm:$0xff] }
  0x78   : > { %420 = vmatmul.f32.gmra.mxu3 %v1494_v0 }
  0x79   : > { %625 = vmatmul.f32.gmra.mxu2 %v977_v1  ;;  %1051 = vmatpush.msra.mxu3 %v1416_v25 }
  0x7b   : > { %348 = vmatmul.f32.gmra.mxu0 %v975_v61  ;;  %1052 = vmatpush.msra.mxu3 %v1422_v28 }
  0x7c   : > { %461 = vmatmul.f32.gmra.mxu1 %v973_v57 }
  0x7d   : > { %1053 = vmatpush.msra.mxu3 %v1428_v31 }
  0x7f   : > { %1054 = vmatpush.msra.mxu3 %v1434_v34 }
  0x80   : > { %423 = vmatmul.f32.gmra.mxu3 %v1501_v2 }
  0x81   : > { %628 = vmatmul.f32.gmra.mxu2 %v978_v3  ;;  %1055 = vmatpush.msra.mxu3 %v1440_v37 }
  0x83   : > { %351 = vmatmul.f32.gmra.mxu0 %v976_v63  ;;  %1056 = vmatpush.msra.mxu3 %v1446_v40 }
  0x84   : > { %464 = vmatmul.f32.gmra.mxu1 %v974_v59 }
  0x85   : > { %1057 = vmatpush.msra.mxu3 %v1450_v43 }
  0x87   : > { %1058 = vmatpush.msra.mxu3 %v1453_v46 }
  0x88   : > { %515 = vmatmul.f32.vlgmr.msrb.gmra.mxu3 %v1508_v4 }
  0x89   : > { %631 = vmatmul.f32.gmra.mxu2 %v979_v5 }
  0x8b   : > { %354 = vmatmul.f32.gmra.mxu0 %v977_v1 }
  0x8c   : > { %467 = vmatmul.f32.gmra.mxu1 %v975_v61 }
  0x90   : > { %518 = vmatmul.f32.gmra.mxu3 %v1513_v6 }
  0x91   : > { %634 = vmatmul.f32.gmra.mxu2 %v980_v7 }
  0x93   : > { %357 = vmatmul.f32.gmra.mxu0 %v978_v3 }
  0x94   : > { %470 = vmatmul.f32.gmra.mxu1 %v976_v63 }
  0x98   : > { %521 = vmatmul.f32.gmra.mxu3 %v1456_v47 }
  0x99   : > { %637 = vmatmul.f32.gmra.mxu2 %v981_v8 }
  0x9b   : > { %360 = vmatmul.f32.gmra.mxu0 %v979_v5 }
  0x9c   : > { %473 = vmatmul.f32.gmra.mxu1 %v977_v1 }
  0xa0   : > { %524 = vmatmul.f32.gmra.mxu3 %v1462_v52 }
  0xa1   : > { %640 = vmatmul.f32.gmra.mxu2 %v982_v9 }
  0xa3   : > { %363 = vmatmul.f32.gmra.mxu0 %v980_v7 }
  0xa4   : > { %476 = vmatmul.f32.gmra.mxu1 %v978_v3 }
  0xa8   : > { %527 = vmatmul.f32.gmra.mxu3 %v1469_v56 }
  0xa9   : > { %643 = vmatmul.f32.gmra.mxu2 %v983_v10 }
  0xab   : > { %366 = vmatmul.f32.gmra.mxu0 %v981_v8 }
  0xac   : > { %479 = vmatmul.f32.gmra.mxu1 %v979_v5 }
  0xb0   : > { %530 = vmatmul.f32.gmra.mxu3 %v1476_v58 }
  0xb1   : > { %646 = vmatmul.f32.gmra.mxu2 %v984_v11 }
  0xb3   : > { %369 = vmatmul.f32.gmra.mxu0 %v982_v9 }
  0xb4   : > { %482 = vmatmul.f32.gmra.mxu1 %v980_v7 }
  0xb8   : > { %533 = vmatmul.f32.gmra.mxu3 %v1482_v60 }
  0xb9   : > { %649 = vmatmul.f32.gmra.mxu2 %v985_v12 }
  0xbb   : > { %372 = vmatmul.f32.gmra.mxu0 %v983_v10 }
  0xbc   : > { %485 = vmatmul.f32.gmra.mxu1 %v981_v8  ;;  %v1002_v8 = vld [vmem:[#allocation2 + $0x118] sm:$0xff] }
  0xc0   : > { %536 = vmatmul.f32.gmra.mxu3 %v1487_v62 }
  0xc1   : > { %652 = vmatmul.f32.gmra.mxu2 %v986_v13 }
  0xc3   : > { %375 = vmatmul.f32.gmra.mxu0 %v984_v11 }
  0xc4   : > { %488 = vmatmul.f32.gmra.mxu1 %v982_v9 }
  0xc8   : > { %v331_v15 = vpop.f32.mrf.mxu0  ;;  %679 = vmatmul.f32.vlgmr.msra.gmra.mxu3 %v1469_v56 }
  0xc9   : > { %655 = vmatmul.f32.gmra.mxu2 %v987_v14  ;;  %v444_v16 = vpop.f32.mrf.mxu1 }
  0xca   : > { %v445_v17 = vadd.f32 %v444_v16, %v331_v15 }
  0xcb   : > { %378 = vmatmul.f32.gmra.mxu0 %v985_v12  ;;  %v1528_v19 = vpop.f32.mrf.mxu3 }
  0xcc   : > { %v608_v20 = vpop.f32.mrf.mxu2  ;;  %491 = vmatmul.f32.gmra.mxu1 %v983_v10 }
  0xcd   : > { %v704_v21 = vadd.f32 %v608_v20, %v445_v17 }
  0xcf   : > { %v740_v23 = vadd.f32 %v1526_v18, %v704_v21 }
  0xd0   : > { %v334_v24 = vpop.f32.mrf.mxu0  ;;  %682 = vmatmul.f32.gmra.mxu3 %v1476_v58 }
  0xd1   : > { %772 = vst [vmem:[%s1368_s5] sm:$0xff] %v740_v23  ;;  %658 = vmatmul.f32.gmra.mxu2 %v988_v22  ;;  %v447_v25 = vpop.f32.mrf.mxu1 }
  0xd2   : > { %v448_v26 = vadd.f32 %v447_v25, %v334_v24 }
  0xd3   : > { %381 = vmatmul.f32.gmra.mxu0 %v986_v13  ;;  %v1533_v27 = vpop.f32.mrf.mxu3 }
  0xd4   : > { %v611_v28 = vpop.f32.mrf.mxu2  ;;  %494 = vmatmul.f32.gmra.mxu1 %v984_v11 }
  0xd5   : > { %v705_v29 = vadd.f32 %v611_v28, %v448_v26 }
  0xd7   : > { %v741_v31 = vadd.f32 %v1526_v18, %v705_v29 }
  0xd8   : > { %v337_v32 = vpop.f32.mrf.mxu0  ;;  %685 = vmatmul.f32.gmra.mxu3 %v1482_v60 }
  0xd9   : > { %773 = vst [vmem:[%s1368_s5 + $0x8] sm:$0xff] %v741_v31  ;;  %661 = vmatmul.f32.gmra.mxu2 %v989_v30  ;;  %v450_v33 = vpop.f32.mrf.mxu1 }
  0xda   : > { %v451_v34 = vadd.f32 %v450_v33, %v337_v32 }
  0xdb   : > { %384 = vmatmul.f32.gmra.mxu0 %v987_v14  ;;  %v1538_v35 = vpop.f32.mrf.mxu3 }
  0xdc   : > { %v614_v36 = vpop.f32.mrf.mxu2  ;;  %497 = vmatmul.f32.gmra.mxu1 %v985_v12 }
  0xdd   : > { %v706_v37 = vadd.f32 %v614_v36, %v451_v34 }
  0xdf   : > { %v742_v39 = vadd.f32 %v1526_v18, %v706_v37 }
  0xe0   : > { %v340_v40 = vpop.f32.mrf.mxu0  ;;  %688 = vmatmul.f32.gmra.mxu3 %v1487_v62  ;;  %v1001_v62 = vld [vmem:[#allocation2 + $0x110] sm:$0xff] }
  0xe1   : > { %774 = vst [vmem:[%s1368_s5 + $0x10] sm:$0xff] %v742_v39  ;;  %664 = vmatmul.f32.gmra.mxu2 %v990_v38  ;;  %v453_v41 = vpop.f32.mrf.mxu1 }
  0xe2   : > { %v454_v42 = vadd.f32 %v453_v41, %v340_v40 }
  0xe3   : > { %387 = vmatmul.f32.gmra.mxu0 %v988_v22  ;;  %v1543_v43 = vpop.f32.mrf.mxu3 }
  0xe4   : > { %v617_v44 = vpop.f32.mrf.mxu2  ;;  %500 = vmatmul.f32.gmra.mxu1 %v986_v13 }
  0xe5   : > { %v707_v45 = vadd.f32 %v617_v44, %v454_v42 }
  0xe7   : > { %v743_v46 = vadd.f32 %v1526_v18, %v707_v45 }
  0xe8   : > { %v343_v48 = vpop.f32.mrf.mxu0  ;;  %691 = vmatmul.f32.gmra.mxu3 %v1494_v0 }
  0xe9   : > { %775 = vst [vmem:[%s1368_s5 + $0x18] sm:$0xff] %v743_v46  ;;  %667 = vmatmul.f32.gmra.mxu2 %v1508_v4  ;;  %v456_v49 = vpop.f32.mrf.mxu1 }
  0xea   : > { %v457_v50 = vadd.f32 %v456_v49, %v343_v48 }
  0xeb   : > { %390 = vmatmul.f32.gmra.mxu0 %v989_v30  ;;  %v1549_v51 = vpop.f32.mrf.mxu3 }
  0xec   : > { %v620_v53 = vpop.f32.mrf.mxu2  ;;  %503 = vmatmul.f32.gmra.mxu1 %v987_v14 }
  0xed   : > { %v708_v54 = vadd.f32 %v620_v53, %v457_v50 }
  0xef   : > { %v744_v55 = vadd.f32 %v1526_v18, %v708_v54 }
  0xf0   : > { %v346_v56 = vpop.f32.mrf.mxu0  ;;  %694 = vmatmul.f32.gmra.mxu3 %v1501_v2 }
  0xf1   : > { %776 = vst [vmem:[%s1368_s5 + $0x20] sm:$0xff] %v744_v55  ;;  %670 = vmatmul.f32.gmra.mxu2 %v1513_v6  ;;  %v459_v57 = vpop.f32.mrf.mxu1 }
  0xf2   : > { %v460_v58 = vadd.f32 %v459_v57, %v346_v56 }
  0xf3   : > { %393 = vmatmul.f32.gmra.mxu0 %v990_v38  ;;  %v1555_v59 = vpop.f32.mrf.mxu3 }
  0xf4   : > { %v623_v60 = vpop.f32.mrf.mxu2  ;;  %506 = vmatmul.f32.gmra.mxu1 %v988_v22 }
  0xf5   : > { %v709_v61 = vadd.f32 %v623_v60, %v460_v58 }
  0xf7   : > { %v745_v63 = vadd.f32 %v1526_v18, %v709_v61 }
  0xf8   : > { %v349_v0 = vpop.f32.mrf.mxu0  ;;  %697 = vmatmul.f32.gmra.mxu3 %v1001_v62 }
  0xf9   : > { %777 = vst [vmem:[%s1368_s5 + $0x28] sm:$0xff] %v745_v63  ;;  %673 = vmatmul.f32.gmra.mxu2 %v1456_v47  ;;  %v462_v1 = vpop.f32.mrf.mxu1 }
  0xfa   : > { %v463_v3 = vadd.f32 %v462_v1, %v349_v0 }
  0xfb   : > { %396 = vmatmul.f32.gmra.mxu0 %v1508_v4  ;;  %v1561_v2 = vpop.f32.mrf.mxu3 }
  0xfc   : > { %v626_v5 = vpop.f32.mrf.mxu2  ;;  %509 = vmatmul.f32.gmra.mxu1 %v989_v30 }
  0xfd   : > { %v710_v7 = vadd.f32 %v626_v5, %v463_v3 }
  0xff   : > { %v746_v9 = vadd.f32 %v1526_v18, %v710_v7 }
 0x100   : > { %v352_v10 = vpop.f32.mrf.mxu0  ;;  %700 = vmatmul.f32.gmra.mxu3 %v1002_v8 }
 0x101   : > { %778 = vst [vmem:[%s1368_s5 + $0x30] sm:$0xff] %v746_v9  ;;  %676 = vmatmul.f32.gmra.mxu2 %v1462_v52  ;;  %v465_v47 = vpop.f32.mrf.mxu1 }
 0x102   : > { %v466_v11 = vadd.f32 %v465_v47, %v352_v10 }
 0x103   : > { %399 = vmatmul.f32.gmra.mxu0 %v1513_v6  ;;  %v1567_v4 = vpop.f32.mrf.mxu3 }
 0x104   : > { %v629_v12 = vpop.f32.mrf.mxu2  ;;  %512 = vmatmul.f32.gmra.mxu1 %v990_v38 }
 0x105   : > { %v711_v13 = vadd.f32 %v629_v12, %v466_v11 }
 0x107   : > { %v747_v14 = vadd.f32 %v1526_v18, %v711_v13 }
 0x108   : > { %v355_v15 = vpop.f32.mrf.mxu0 }
 0x109   : > { %779 = vst [vmem:[%s1368_s5 + $0x38] sm:$0xff] %v747_v14  ;;  %v468_v16 = vpop.f32.mrf.mxu1 }
 0x10a   : > { %v469_v17 = vadd.f32 %v468_v16, %v355_v15 }
 0x10b   : > { %v1571_v20 = vpop.f32.mrf.mxu3 }
 0x10c   : > { %v632_v52 = vpop.f32.mrf.mxu2 }
 0x10d   : > { %v712_v21 = vadd.f32 %v632_v52, %v469_v17 }
 0x10f   : > { %v748_v22 = vadd.f32 %v1526_v18, %v712_v21  ;;  %v517_v21 = vadd.f32 %v1571_v20, %v1528_v19 }
 0x110   : > { %v358_v23 = vpop.f32.mrf.mxu0 }
 0x111   : > { %780 = vst [vmem:[%s1368_s5 + $0x40] sm:$0xff] %v748_v22  ;;  %v471_v6 = vpop.f32.mrf.mxu1 }
 0x112   : > { %v472_v24 = vadd.f32 %v471_v6, %v358_v23 }
 0x113   : > { %v1575_v25 = vpop.f32.mrf.mxu3 }
 0x114   : > { %v635_v26 = vpop.f32.mrf.mxu2 }
 0x115   : > { %v713_v28 = vadd.f32 %v635_v26, %v472_v24 }
 0x117   : > { %v749_v29 = vadd.f32 %v1526_v18, %v713_v28 }
 0x118   : > { %v361_v30 = vpop.f32.mrf.mxu0 }
 0x119   : > { %781 = vst [vmem:[%s1368_s5 + $0x48] sm:$0xff] %v749_v29  ;;  %v474_v31 = vpop.f32.mrf.mxu1 }
 0x11a   : > { %v475_v32 = vadd.f32 %v474_v31, %v361_v30 }
 0x11b   : > { %v1579_v33 = vpop.f32.mrf.mxu3 }
 0x11c   : > { %v638_v34 = vpop.f32.mrf.mxu2 }
 0x11d   : > { %v714_v36 = vadd.f32 %v638_v34, %v475_v32  ;;  %v520_v32 = vadd.f32 %v1575_v25, %v1533_v27 }
 0x11f   : > { %v750_v37 = vadd.f32 %v1526_v18, %v714_v36 }
 0x120   : > { %v364_v38 = vpop.f32.mrf.mxu0 }
 0x121   : > { %782 = vst [vmem:[%s1368_s5 + $0x50] sm:$0xff] %v750_v37  ;;  %v477_v39 = vpop.f32.mrf.mxu1 }
 0x122   : > { %v478_v40 = vadd.f32 %v477_v39, %v364_v38 }
 0x123   : > { %v1583_v41 = vpop.f32.mrf.mxu3 }
 0x124   : > { %v641_v42 = vpop.f32.mrf.mxu2 }
 0x125   : > { %v715_v44 = vadd.f32 %v641_v42, %v478_v40 }
 0x127   : > { %v751_v45 = vadd.f32 %v1526_v18, %v715_v44  ;;  %v523_v44 = vadd.f32 %v1579_v33, %v1538_v35 }
 0x128   : > { %v367_v46 = vpop.f32.mrf.mxu0 }
 0x129   : > { %783 = vst [vmem:[%s1368_s5 + $0x58] sm:$0xff] %v751_v45  ;;  %v480_v48 = vpop.f32.mrf.mxu1 }
 0x12a   : > { %v481_v49 = vadd.f32 %v480_v48, %v367_v46 }
 0x12b   : > { %v1587_v50 = vpop.f32.mrf.mxu3 }
 0x12c   : > { %v644_v53 = vpop.f32.mrf.mxu2 }
 0x12d   : > { %v716_v54 = vadd.f32 %v644_v53, %v481_v49 }
 0x12f   : > { %v752_v55 = vadd.f32 %v1526_v18, %v716_v54 }
 0x130   : > { %v370_v56 = vpop.f32.mrf.mxu0 }
 0x131   : > { %784 = vst [vmem:[%s1368_s5 + $0x60] sm:$0xff] %v752_v55  ;;  %v483_v57 = vpop.f32.mrf.mxu1 }
 0x132   : > { %v484_v58 = vadd.f32 %v483_v57, %v370_v56  ;;  %v526_v56 = vadd.f32 %v1583_v41, %v1543_v43 }
 0x133   : > { %v1591_v60 = vpop.f32.mrf.mxu3 }
 0x134   : > { %v647_v61 = vpop.f32.mrf.mxu2 }
 0x135   : > { %v717_v62 = vadd.f32 %v647_v61, %v484_v58 }
 0x137   : > { %v753_v63 = vadd.f32 %v1526_v18, %v717_v62 }
 0x138   : > { %v373_v0 = vpop.f32.mrf.mxu0 }
 0x139   : > { %785 = vst [vmem:[%s1368_s5 + $0x68] sm:$0xff] %v753_v63  ;;  %v486_v1 = vpop.f32.mrf.mxu1 }
 0x13a   : > { %v487_v3 = vadd.f32 %v486_v1, %v373_v0 }
 0x13b   : > { %v1595_v5 = vpop.f32.mrf.mxu3 }
 0x13c   : > { %v650_v7 = vpop.f32.mrf.mxu2 }
 0x13d   : > { %v718_v8 = vadd.f32 %v650_v7, %v487_v3  ;;  %v529_v3 = vadd.f32 %v1587_v50, %v1549_v51 }
 0x13f   : > { %v754_v9 = vadd.f32 %v1526_v18, %v718_v8 }
 0x140   : > { %v376_v10 = vpop.f32.mrf.mxu0 }
 0x141   : > { %786 = vst [vmem:[%s1368_s5 + $0x70] sm:$0xff] %v754_v9  ;;  %v489_v47 = vpop.f32.mrf.mxu1 }
 0x142   : > { %v490_v11 = vadd.f32 %v489_v47, %v376_v10 }
 0x143   : > { %v1599_v12 = vpop.f32.mrf.mxu3 }
 0x144   : > { %v653_v13 = vpop.f32.mrf.mxu2 }
 0x145   : > { %v719_v14 = vadd.f32 %v653_v13, %v490_v11 }
 0x147   : > { %v755_v15 = vadd.f32 %v1526_v18, %v719_v14  ;;  %v532_v14 = vadd.f32 %v1591_v60, %v1555_v59 }
 0x148   : > { %v379_v16 = vpop.f32.mrf.mxu0 }
 0x149   : > { %787 = vst [vmem:[%s1368_s5 + $0x78] sm:$0xff] %v755_v15  ;;  %v492_v17 = vpop.f32.mrf.mxu1 }
 0x14a   : > { %v493_v52 = vadd.f32 %v492_v17, %v379_v16 }
 0x14b   : > { %v680_v23 = vpop.f32.mrf.mxu3 }
 0x14c   : > { %v656_v22 = vpop.f32.mrf.mxu2  ;;  %v728_v24 = vadd.f32 %v680_v23, %v517_v21 }
 0x14d   : > { %v720_v6 = vadd.f32 %v656_v22, %v493_v52 }
 0x14e   : > { %v764_v28 = vadd.f32 %v1526_v18, %v728_v24 }
 0x14f   : > { %v756_v26 = vadd.f32 %v1526_v18, %v720_v6  ;;  %v535_v6 = vadd.f32 %v1595_v5, %v1561_v2  ;;  %v538_v5 = vadd.f32 %v1599_v12, %v1567_v4 }
 0x150   : > { %v382_v29 = vpop.f32.mrf.mxu0  ;;  %796 = vst [vmem:[%s1368_s5 + $0xc0] sm:$0xff] %v764_v28 }
 0x151   : > { %788 = vst [vmem:[%s1368_s5 + $0x80] sm:$0xff] %v756_v26  ;;  %v495_v30 = vpop.f32.mrf.mxu1 }
 0x152   : > { %v496_v31 = vadd.f32 %v495_v30, %v382_v29 }
 0x153   : > { %v683_v19 = vpop.f32.mrf.mxu3 }
 0x154   : > { %v659_v34 = vpop.f32.mrf.mxu2  ;;  %v729_v36 = vadd.f32 %v683_v19, %v520_v32 }
 0x155   : > { %v721_v20 = vadd.f32 %v659_v34, %v496_v31 }
 0x156   : > { %v765_v38 = vadd.f32 %v1526_v18, %v729_v36 }
 0x157   : > { %v757_v37 = vadd.f32 %v1526_v18, %v721_v20 }
 0x158   : > { %v385_v39 = vpop.f32.mrf.mxu0  ;;  %797 = vst [vmem:[%s1368_s5 + $0xc8] sm:$0xff] %v765_v38 }
 0x159   : > { %789 = vst [vmem:[%s1368_s5 + $0x88] sm:$0xff] %v757_v37  ;;  %v498_v40 = vpop.f32.mrf.mxu1 }
 0x15a   : > { %v499_v42 = vadd.f32 %v498_v40, %v385_v39 }
 0x15b   : > { %v686_v27 = vpop.f32.mrf.mxu3 }
 0x15c   : > { %v662_v45 = vpop.f32.mrf.mxu2  ;;  %v730_v46 = vadd.f32 %v686_v27, %v523_v44 }
 0x15d   : > { %v722_v25 = vadd.f32 %v662_v45, %v499_v42 }
 0x15e   : > { %v766_v49 = vadd.f32 %v1526_v18, %v730_v46 }
 0x15f   : > { %v758_v48 = vadd.f32 %v1526_v18, %v722_v25 }
 0x160   : > { %v388_v53 = vpop.f32.mrf.mxu0  ;;  %798 = vst [vmem:[%s1368_s5 + $0xd0] sm:$0xff] %v766_v49 }
 0x161   : > { %790 = vst [vmem:[%s1368_s5 + $0x90] sm:$0xff] %v758_v48  ;;  %v501_v54 = vpop.f32.mrf.mxu1 }
 0x162   : > { %v502_v55 = vadd.f32 %v501_v54, %v388_v53 }
 0x163   : > { %v689_v35 = vpop.f32.mrf.mxu3 }
 0x164   : > { %v665_v57 = vpop.f32.mrf.mxu2  ;;  %v731_v58 = vadd.f32 %v689_v35, %v526_v56 }
 0x165   : > { %v723_v33 = vadd.f32 %v665_v57, %v502_v55 }
 0x166   : > { %v767_v62 = vadd.f32 %v1526_v18, %v731_v58 }
 0x167   : > { %v759_v61 = vadd.f32 %v1526_v18, %v723_v33 }
 0x168   : > { %v391_v63 = vpop.f32.mrf.mxu0  ;;  %799 = vst [vmem:[%s1368_s5 + $0xd8] sm:$0xff] %v767_v62 }
 0x169   : > { %791 = vst [vmem:[%s1368_s5 + $0x98] sm:$0xff] %v759_v61  ;;  %v504_v0 = vpop.f32.mrf.mxu1 }
 0x16a   : > { %v505_v1 = vadd.f32 %v504_v0, %v391_v63 }
 0x16b   : > { %v692_v43 = vpop.f32.mrf.mxu3 }
 0x16c   : > { %v668_v7 = vpop.f32.mrf.mxu2  ;;  %v732_v8 = vadd.f32 %v692_v43, %v529_v3 }
 0x16d   : > { %v724_v41 = vadd.f32 %v668_v7, %v505_v1 }
 0x16e   : > { %v768_v10 = vadd.f32 %v1526_v18, %v732_v8 }
 0x16f   : > { %v760_v9 = vadd.f32 %v1526_v18, %v724_v41 }
 0x170   : > { %v394_v47 = vpop.f32.mrf.mxu0  ;;  %800 = vst [vmem:[%s1368_s5 + $0xe0] sm:$0xff] %v768_v10 }
 0x171   : > { %792 = vst [vmem:[%s1368_s5 + $0xa0] sm:$0xff] %v760_v9  ;;  %v507_v11 = vpop.f32.mrf.mxu1 }
 0x172   : > { %v508_v13 = vadd.f32 %v507_v11, %v394_v47 }
 0x173   : > { %v695_v51 = vpop.f32.mrf.mxu3 }
 0x174   : > { %v671_v15 = vpop.f32.mrf.mxu2  ;;  %v733_v16 = vadd.f32 %v695_v51, %v532_v14 }
 0x175   : > { %v725_v50 = vadd.f32 %v671_v15, %v508_v13 }
 0x176   : > { %v769_v52 = vadd.f32 %v1526_v18, %v733_v16 }
 0x177   : > { %v761_v17 = vadd.f32 %v1526_v18, %v725_v50 }
 0x178   : > { %v397_v21 = vpop.f32.mrf.mxu0  ;;  %801 = vst [vmem:[%s1368_s5 + $0xe8] sm:$0xff] %v769_v52 }
 0x179   : > { %793 = vst [vmem:[%s1368_s5 + $0xa8] sm:$0xff] %v761_v17  ;;  %v510_v22 = vpop.f32.mrf.mxu1 }
 0x17a   : > { %v511_v23 = vadd.f32 %v510_v22, %v397_v21 }
 0x17b   : > { %v698_v60 = vpop.f32.mrf.mxu3 }
 0x17c   : > { %v674_v59 = vpop.f32.mrf.mxu2  ;;  %v734_v26 = vadd.f32 %v698_v60, %v535_v6 }
 0x17d   : > { %v726_v24 = vadd.f32 %v674_v59, %v511_v23 }
 0x17e   : > { %v770_v29 = vadd.f32 %v1526_v18, %v734_v26 }
 0x17f   : > { %v762_v28 = vadd.f32 %v1526_v18, %v726_v24 }
 0x180   : > { %v400_v30 = vpop.f32.mrf.mxu0  ;;  %802 = vst [vmem:[%s1368_s5 + $0xf0] sm:$0xff] %v770_v29 }
 0x181   : > { %794 = vst [vmem:[%s1368_s5 + $0xb0] sm:$0xff] %v762_v28  ;;  %v513_v31 = vpop.f32.mrf.mxu1 }
 0x182   : > { %v514_v2 = vadd.f32 %v513_v31, %v400_v30 }
 0x183   : > { %v701_v34 = vpop.f32.mrf.mxu3 }
 0x184   : > { %v677_v32 = vpop.f32.mrf.mxu2  ;;  %v735_v20 = vadd.f32 %v701_v34, %v538_v5 }
 0x185   : > { %v727_v19 = vadd.f32 %v677_v32, %v514_v2 }
 0x186   : > { %v771_v37 = vadd.f32 %v1526_v18, %v735_v20 }
 0x187   : > { %v763_v36 = vadd.f32 %v1526_v18, %v727_v19 }
 0x188   : > { %803 = vst [vmem:[%s1368_s5 + $0xf8] sm:$0xff] %v771_v37 }
 0x189   : > { %795 = vst [vmem:[%s1368_s5 + $0xb8] sm:$0xff] %v763_v36 }
 0x18a   : > { %1212 = shalt.err (!%p1209_p13)
}
 0x18b   : > { %s1275_s6 = smov 128   ;;  %s1276_s5 = smov 8  }
 0x18c   : > { %1063 = dma.vmem_to_hbm [thread:$0]  (%p1337_p4), %s820_s15, 4096, %s822_s19, %s805_s21, %s1275_s6, %s1275_s6, %s1276_s5  }
 0x18d PF: > { %p1075_p0 = scmp.ge.s32.totalorder %s1269_s17, 2  ;;  %s836_s7 = sand.u32 1, %s1249_s12  }
 0x18e   : > { %s837_s8 = scalar_lea.sflag [#allocation6], %s836_s7 }
 0x18f   : > { %p1070_p1 = pnand %p1075_p0, %p1344_p8 }
 0x191   : > { %p1071_p2 = pneg %p1070_p1 }
 0x193   : > { %1244 = dma.done.wait (%p1071_p2), %s837_s8, 4096  }
 0x194   : > { %1246 = vsyncadd (%p1071_p2), %s837_s8, 4294963200  ;;  %s17_s17 = sadd.s32 1, %s1269_s17   ;;  %s1696_s12 = smov %s1253_s13 }
 0x195   : > { %p14_p3 = scmp.ge.s32.totalorder %s17_s17, 4   ;;  %s1697_s13 = smov %s1257_s14 }
 0x196   : > { %s1698_s14 = smov %s1350_s25  ;;  %s1699_s15 = smov %s1265_s16 }
 0x197   : > { %s1700_s16 = smov %s1702_s20  ;;  %16 = sbr.rel (!%p14_p3) target bundleno = 5 (0x5), region = 94 }
 0x19c   :  { %843 = vsyncpa [#allocation5], 1 }
 0x19d   :  { %845 = vsyncpa [#allocation5 + $0x1], 1 }
 0x19e   :  { %846 = vsyncpa [#allocation6], 1 }
 0x19f   :  { %848 = vsyncpa [#allocation6 + $0x1], 1 }
 0x1a0   :  { %849 = vsyncmov [#allocation3] }
 0x1a3   :  { %s850_s22 = vpop.sfrf %849 }
 0x1a4   :  { %p1008_p4 = scmp.ne.s32.totalorder %s850_s22, 0 }
 0x1a6   :  { %854 = shalt.err (%p1008_p4)  }
 0x1a7   :  { %856 = vsyncmov [#allocation3 + $0x1] }
 0x1aa   :  { %s857_s24 = vpop.sfrf %856 }
 0x1ab   :  { %p1009_p8 = scmp.ne.s32.totalorder %s857_s24, 0 }
 0x1ad   :  { %861 = shalt.err (%p1009_p8)  }

</bundles_post_ra>
